<compile_context>
chip_gen: v6e
topology: v6e:2x2x1
jax: 0.10.0
libtpu: 0.0.40
codegen_flags: <defaults>
</compile_context>

<pallas_src>
import functools

import jax
import jax.numpy as jnp
from jax.experimental import pallas as pl
from jax.experimental.pallas import tpu as pltpu


def _cdiv(a, b):
    return (a + b - 1) // b


def _round_up(x, m):
    return _cdiv(x, m) * m


def _realnvp_kernel(a_ref, b_ref, w1_ref, b1_ref, w2_ref, b2_ref,
                    out_b_ref, dlogp_ref, *, d_right: int, inverse: bool):
    """Affine coupling on one batch tile (batch-major layout).

    a_ref:     [tb, d_left]      input that drives the transform MLP
    b_ref:     [tb, d_right]     coupled half that gets scaled/shifted
    w1_ref:    [d_left, H]       b1_ref: [1, H]
    w2_ref:    [H, 2*d_right]    b2_ref: [1, 2*d_right]   (fused heads)
    out_b_ref: [tb, d_right]
    dlogp_ref: [tb, 1]
    """
    a = a_ref[...]
    b = b_ref[...]

    # Hidden layer on the MXU: [tb, H].
    h = jnp.tanh(
        jnp.dot(a, w1_ref[...], preferred_element_type=jnp.float32)
        + b1_ref[...])

    # Single fused head matmul: [tb, 2*d_right]; static lane slices below are
    # cheap (XLU) and avoid splitting W2 in the wrapper.
    heads = (jnp.dot(h, w2_ref[...], preferred_element_type=jnp.float32)
             + b2_ref[...])
    log_scale = heads[:, :d_right]
    shift = heads[:, d_right:]

    # Faithful log-det: sum the actual log_scale values (XLU lane reduce);
    # no reassociation through a pre-summed weight column.
    dlogp = jnp.sum(log_scale, axis=-1, keepdims=True)        # [tb, 1]

    if inverse:
        out_b_ref[...] = jnp.exp(-log_scale) * (b - shift)
        dlogp_ref[...] = -dlogp
    else:
        out_b_ref[...] = jnp.exp(log_scale) * b + shift
        dlogp_ref[...] = dlogp


def _choose_batch_tile(B: int, block_b: int) -> int:
    """Pick the batch tile (rows per grid step).

    - Small batches (< 1024): one block covering the whole batch.
    - Otherwise: guarantee >= 2 grid steps (v7x megacore: 2 TensorCores share
      the "parallel" batch axis), target ~8 steps for large batches so each
      core's double-buffer pipelines, but never shrink a tile below 1024 rows
      (keeps per-step DMA well above the ~0.35 us fixed pipeline overhead) and
      never above block_b (VMEM).
    """
    if B < 1024:
        return B
    target = max(_cdiv(B, 8), 1024)
    tb = min(block_b, _round_up(target, 128))
    tb = min(tb, _round_up(_cdiv(B, 2), 128))   # guarantee >= 2 steps
    return tb


@functools.partial(jax.jit, static_argnames=("inverse", "block_b"))
def realnvp_layer(x_left, x_right, params, *, inverse: bool = False,
                  block_b: int = 4096):
    """Pallas implementation of RealNVPLayer.forward.

    Returns (x_left_out, x_right_out, dlogp) with the same swap semantics as
    the PyTorch module.  dlogp has shape [B, 1].
    """
    w1, b1, w2, b2 = params

    if inverse:
        x_left, x_right = x_right, x_left

    # `a` drives the transform, `b` is the coupled half.
    a, b = x_left, x_right
    B, d_left = a.shape
    _, d_right = b.shape
    H = w1.shape[1]
    assert w1.shape == (d_left, H)
    assert b1.shape == (H,)
    assert w2.shape == (H, 2 * d_right)
    assert b2.shape == (2 * d_right,)

    f32 = jnp.float32
    a = a.astype(f32)
    b = b.astype(f32)
    # Only remaining "preprocessing": trivial bias reshapes (constant-folded
    # under jit).  W1/W2 are passed through unchanged.
    w1_f = w1.astype(f32)
    b1_r = b1.reshape(1, H).astype(f32)
    w2_f = w2.astype(f32)
    b2_r = b2.reshape(1, 2 * d_right).astype(f32)

    tb = _choose_batch_tile(B, block_b)
    grid = (_cdiv(B, tb),)

    def batch_spec(d):
        # Activation/output tiles walk the batch (row) axis with the grid.
        return pl.BlockSpec((tb, d), lambda i: (i, 0))

    def resident_spec(shape):
        # Weights / biases: same block every step -> stay VMEM-resident.
        return pl.BlockSpec(shape, lambda i: (0, 0))

    kernel = functools.partial(_realnvp_kernel, d_right=d_right,
                               inverse=inverse)

    out_b, dlogp = pl.pallas_call(
        kernel,
        grid=grid,
        in_specs=[
            batch_spec(d_left),                # a
            batch_spec(d_right),               # b
            resident_spec((d_left, H)),        # w1
            resident_spec((1, H)),             # b1
            resident_spec((H, 2 * d_right)),   # w2 (fused heads)
            resident_spec((1, 2 * d_right)),   # b2
        ],
        out_specs=[
            batch_spec(d_right),               # out_b  [B, d_right]
            batch_spec(1),                     # dlogp  [B, 1]
        ],
        out_shape=[
            jax.ShapeDtypeStruct((B, d_right), f32),
            jax.ShapeDtypeStruct((B, 1), f32),
        ],
        compiler_params=pltpu.CompilerParams(
            dimension_semantics=("parallel",),
            vmem_limit_bytes=48 * 1024 * 1024),
    )(a, b, w1_f, b1_r, w2_f, b2_r)

    if inverse:
        # x_left stays as the (swapped) transform input, x_right is transformed.
        return a, out_b, dlogp
    else:
        # forward: swap back -> (transformed x_right, original x_left, dlogp)
        return out_b, a, dlogp


def _reference(x_left, x_right, params, *, inverse: bool = False):
    """Pure-JAX reference matching the PyTorch semantics."""
    w1, b1, w2, b2 = params
    if inverse:
        x_left, x_right = x_right, x_left
    h = jnp.tanh(x_left @ w1 + b1)
    lss = h @ w2 + b2
    d_right = x_right.shape[-1]
    log_scale = lss[..., :d_right]
    shift = lss[..., d_right:]
    if inverse:
        x_right = jnp.exp(-log_scale) * (x_right - shift)
        dlogp = -log_scale.sum(axis=-1, keepdims=True)
    else:
        x_right = jnp.exp(log_scale) * x_right + shift
        dlogp = log_scale.sum(axis=-1, keepdims=True)
    if not inverse:
        x_left, x_right = x_right, x_left
    return x_left, x_right, dlogp


def _check(B, D_LEFT, D_RIGHT, H, seed):
    key = jax.random.PRNGKey(seed)
    k_xl, k_xr, k_w1, k_b1, k_w2, k_b2 = jax.random.split(key, 6)

    x_left = jax.random.normal(k_xl, (B, D_LEFT), dtype=jnp.float32)
    x_right = jax.random.normal(k_xr, (B, D_RIGHT), dtype=jnp.float32)

    # Deterministic MLP transform parameters (small scale so exp() stays tame).
    w1 = 0.1 * jax.random.normal(k_w1, (D_LEFT, H), dtype=jnp.float32)
    b1 = 0.1 * jax.random.normal(k_b1, (H,), dtype=jnp.float32)
    w2 = 0.1 * jax.random.normal(k_w2, (H, 2 * D_RIGHT), dtype=jnp.float32)
    b2 = 0.1 * jax.random.normal(k_b2, (2 * D_RIGHT,), dtype=jnp.float32)
    params = (w1, b1, w2, b2)

    # Forward.
    yl, yr, dlogp = realnvp_layer(x_left, x_right, params, inverse=False)
    jax.block_until_ready((yl, yr, dlogp))
    rl, rr, rd = _reference(x_left, x_right, params, inverse=False)
    assert jnp.allclose(yl, rl, atol=1e-4), "x_left mismatch (forward)"
    assert jnp.allclose(yr, rr, atol=1e-4), "x_right mismatch (forward)"
    assert jnp.allclose(dlogp, rd, atol=1e-4), "dlogp mismatch (forward)"

    # Inverse.
    il, ir, idlp = realnvp_layer(yl, yr, params, inverse=True)
    jax.block_until_ready((il, ir, idlp))
    ril, rir, rid = _reference(yl, yr, params, inverse=True)
    assert jnp.allclose(il, ril, atol=1e-4), "x_left mismatch (inverse)"
    assert jnp.allclose(ir, rir, atol=1e-4), "x_right mismatch (inverse)"
    assert jnp.allclose(idlp, rid, atol=1e-4), "dlogp mismatch (inverse)"


if __name__ == "__main__":
    # Small batch: single block, block rows == full batch.
    _check(B=8, D_LEFT=16, D_RIGHT=16, H=32, seed=0)
    # Batch exercising the parallel 1-D grid (>= 2 steps for v7x megacore).
    _check(B=1024, D_LEFT=16, D_RIGHT=16, H=32, seed=1)
    # Ragged batch: last grid block is partial (masked stores).
    _check(B=1300, D_LEFT=16, D_RIGHT=16, H=32, seed=2)
    print("KERNEL_OK")
</pallas_src>

<mosaic_0001>
module attributes {stable_mosaic.version = 11 : i64} {
  func.func @_realnvp_kernel(%arg0: i32, %arg1: memref<8x16xf32, #tpu.memory_space<vmem>>, %arg2: memref<8x16xf32, #tpu.memory_space<vmem>>, %arg3: memref<16x32xf32, #tpu.memory_space<vmem>>, %arg4: memref<1x32xf32, #tpu.memory_space<vmem>>, %arg5: memref<32x32xf32, #tpu.memory_space<vmem>>, %arg6: memref<1x32xf32, #tpu.memory_space<vmem>>, %arg7: memref<8x16xf32, #tpu.memory_space<vmem>>, %arg8: memref<8x1xf32, #tpu.memory_space<vmem>>) attributes {dimension_semantics = [#tpu.dimension_semantics<parallel>], iteration_bounds = array<i64: 1>, scalar_prefetch = 0 : i64, scratch_operands = 0 : i64, tpu.core_type = #tpu.core_type<tc>, window_params = [{transform_indices = @transform_0, window_bounds = array<i64: 8, 16>}, {transform_indices = @transform_1, window_bounds = array<i64: 8, 16>}, {pipeline_mode = #tpu.pipeline_mode<synchronous>, transform_indices = @transform_2, window_bounds = array<i64: 16, 32>}, {pipeline_mode = #tpu.pipeline_mode<synchronous>, transform_indices = @transform_3, window_bounds = array<i64: 1, 32>}, {pipeline_mode = #tpu.pipeline_mode<synchronous>, transform_indices = @transform_4, window_bounds = array<i64: 32, 32>}, {pipeline_mode = #tpu.pipeline_mode<synchronous>, transform_indices = @transform_5, window_bounds = array<i64: 1, 32>}, {transform_indices = @transform_6, window_bounds = array<i64: 8, 16>}, {transform_indices = @transform_7, window_bounds = array<i64: 8, 1>}]} {
    %c0 = arith.constant 0 : index
    %c0_0 = arith.constant 0 : index
    %0 = vector.load %arg1[%c0, %c0_0] : memref<8x16xf32, #tpu.memory_space<vmem>>, vector<8x16xf32>
    %c0_1 = arith.constant 0 : index
    %c0_2 = arith.constant 0 : index
    %1 = vector.load %arg2[%c0_1, %c0_2] : memref<8x16xf32, #tpu.memory_space<vmem>>, vector<8x16xf32>
    %c0_3 = arith.constant 0 : index
    %c0_4 = arith.constant 0 : index
    %2 = vector.load %arg3[%c0_3, %c0_4] : memref<16x32xf32, #tpu.memory_space<vmem>>, vector<16x32xf32>
    %cst = arith.constant dense<0.000000e+00> : vector<8x32xf32>
    %3 = tpu.matmul %0, %2, %cst {dimension_numbers = #tpu.dot_dimension_numbers<[1], [0], [0], [1], [0, 0, 1, 1], [], []>} : vector<8x16xf32>, vector<16x32xf32>, vector<8x32xf32> -> vector<8x32xf32>
    %c0_5 = arith.constant 0 : index
    %c0_6 = arith.constant 0 : index
    %4 = vector.load %arg4[%c0_5, %c0_6] : memref<1x32xf32, #tpu.memory_space<vmem>>, vector<1x32xf32>
    %5 = vector.broadcast %4 : vector<1x32xf32> to vector<8x32xf32>
    %6 = arith.addf %3, %5 : vector<8x32xf32>
    %7 = math.tanh %6 : vector<8x32xf32>
    %c0_7 = arith.constant 0 : index
    %c0_8 = arith.constant 0 : index
    %8 = vector.load %arg5[%c0_7, %c0_8] : memref<32x32xf32, #tpu.memory_space<vmem>>, vector<32x32xf32>
    %cst_9 = arith.constant dense<0.000000e+00> : vector<8x32xf32>
    %9 = tpu.matmul %7, %8, %cst_9 {dimension_numbers = #tpu.dot_dimension_numbers<[1], [0], [0], [1], [0, 0, 1, 1], [], []>} : vector<8x32xf32>, vector<32x32xf32>, vector<8x32xf32> -> vector<8x32xf32>
    %c0_10 = arith.constant 0 : index
    %c0_11 = arith.constant 0 : index
    %10 = vector.load %arg6[%c0_10, %c0_11] : memref<1x32xf32, #tpu.memory_space<vmem>>, vector<1x32xf32>
    %11 = vector.broadcast %10 : vector<1x32xf32> to vector<8x32xf32>
    %12 = arith.addf %9, %11 : vector<8x32xf32>
    %13 = vector.extract_strided_slice %12 {offsets = [0, 0], sizes = [8, 16], strides = [1, 1]} : vector<8x32xf32> to vector<8x16xf32>
    %14 = vector.extract_strided_slice %12 {offsets = [0, 16], sizes = [8, 16], strides = [1, 1]} : vector<8x32xf32> to vector<8x16xf32>
    %cst_12 = arith.constant dense<0.000000e+00> : vector<8xf32>
    %15 = vector.multi_reduction <add>, %13, %cst_12 [1] : vector<8x16xf32> to vector<8xf32>
    %16 = vector.shape_cast %15 : vector<8xf32> to vector<8x1xf32>
    %17 = math.exp %13 : vector<8x16xf32>
    %18 = arith.mulf %17, %1 : vector<8x16xf32>
    %19 = arith.addf %18, %14 : vector<8x16xf32>
    %c0_13 = arith.constant 0 : index
    %c0_14 = arith.constant 0 : index
    %20 = vector.load %arg7[%c0_13, %c0_14] : memref<8x16xf32, #tpu.memory_space<vmem>>, vector<8x16xf32>
    tpu.vector_store %arg7[%c0_13, %c0_14], %19 {strides = array<i32>} : memref<8x16xf32, #tpu.memory_space<vmem>>, vector<8x16xf32>,
    %c0_15 = arith.constant 0 : index
    %c0_16 = arith.constant 0 : index
    %21 = vector.load %arg8[%c0_15, %c0_16] : memref<8x1xf32, #tpu.memory_space<vmem>>, vector<8x1xf32>
    tpu.vector_store %arg8[%c0_15, %c0_16], %16 {strides = array<i32>} : memref<8x1xf32, #tpu.memory_space<vmem>>, vector<8x1xf32>,
    return
  }
  func.func @transform_0(%arg0: i32) -> (i32, i32) {
    %c0_i32 = arith.constant 0 : i32
    %c0_i32_0 = arith.constant 0 : i32
    return %arg0, %c0_i32 : i32, i32
  }
  func.func @transform_1(%arg0: i32) -> (i32, i32) {
    %c0_i32 = arith.constant 0 : i32
    %c0_i32_0 = arith.constant 0 : i32
    return %arg0, %c0_i32 : i32, i32
  }
  func.func @transform_2(%arg0: i32) -> (i32, i32) {
    %c0_i32 = arith.constant 0 : i32
    %c0_i32_0 = arith.constant 0 : i32
    %c0_i32_1 = arith.constant 0 : i32
    return %c0_i32, %c0_i32_0 : i32, i32
  }
  func.func @transform_3(%arg0: i32) -> (i32, i32) {
    %c0_i32 = arith.constant 0 : i32
    %c0_i32_0 = arith.constant 0 : i32
    %c0_i32_1 = arith.constant 0 : i32
    return %c0_i32, %c0_i32_0 : i32, i32
  }
  func.func @transform_4(%arg0: i32) -> (i32, i32) {
    %c0_i32 = arith.constant 0 : i32
    %c0_i32_0 = arith.constant 0 : i32
    %c0_i32_1 = arith.constant 0 : i32
    return %c0_i32, %c0_i32_0 : i32, i32
  }
  func.func @transform_5(%arg0: i32) -> (i32, i32) {
    %c0_i32 = arith.constant 0 : i32
    %c0_i32_0 = arith.constant 0 : i32
    %c0_i32_1 = arith.constant 0 : i32
    return %c0_i32, %c0_i32_0 : i32, i32
  }
  func.func @transform_6(%arg0: i32) -> (i32, i32) {
    %c0_i32 = arith.constant 0 : i32
    %c0_i32_0 = arith.constant 0 : i32
    return %arg0, %c0_i32 : i32, i32
  }
  func.func @transform_7(%arg0: i32) -> (i32, i32) {
    %c0_i32 = arith.constant 0 : i32
    %c0_i32_0 = arith.constant 0 : i32
    return %arg0, %c0_i32 : i32, i32
  }
}

</mosaic_0001>

<bundles_post_ra>
// kernel: realnvp_layer.1
= control target key start
LH: loop header
LB: loop body
LE: loop exit
PB: predicated region body
PF: predicated region fallthrough
CT: control target
= control target key end

     0   :  { %13 = vsyncpa [#allocation3], 0  ;;  %s512_s0 = inlined_call_operand.hbm [shape: f32[8,16], index: 0, kind: input, shape index: {}]   ;;  %s513_s1 = inlined_call_operand.hbm [shape: f32[8,16], index: 1, kind: input, shape index: {}]   ;;  %s514_s2 = inlined_call_operand.hbm [shape: f32[16,32], index: 2, kind: input, shape index: {}]   ;;  %s515_s3 = inlined_call_operand.vmem [shape: f32[1,32], index: 3, kind: input, shape index: {}]   ;;  %s516_s4 = inlined_call_operand.hbm [shape: f32[32,32], index: 4, kind: input, shape index: {}]   ;;  %s517_s5 = inlined_call_operand.vmem [shape: f32[1,32], index: 5, kind: input, shape index: {}]   ;;  %s518_s6 = inlined_call_operand.hbm [shape: f32[8,16], index: 6, kind: output, shape index: {0}]   ;;  %s519_s7 = inlined_call_operand.vmem [shape: f32[8,1], index: 7, kind: output, shape index: {1}]  }
   0x1   :  { %14 = vsyncpa [#allocation6], 0 }
   0x2   :  { %15 = vsyncpa [#allocation9], 0 }
   0x3   :  { %16 = vsyncpa [#allocation4], 0  ;;  %s435_s24 = smov [#allocation5]   ;;  %s436_s26 = smov [#allocation2]  }
   0x4   :  { %s33_s25 = sshll.u32 %s435_s24, 4  ;;  %s23_s27 = sshll.u32 %s436_s26, 4  ;;  %s34_s25 = int_to_ptr.vmem [resolvable:$true] %s33_s25  ;;  %s24_s27 = int_to_ptr.vmem [resolvable:$true] %s23_s27 }
   0x5   :  { %s335_s28 = scalar_lea.vmem %s34_s25, 128  ;;  %p340_p1 = scmp.lt.s32.totalorder %s34_s25, %s34_s25 }
   0x6   :  { %p336_p0 = scmp.ne.s32.totalorder %s34_s25, %s335_s28  ;;  %p341_p2 = scmp.lt.s32.totalorder %s335_s28, %s335_s28 }
   0x8   :  { %p342_p3 = por %p341_p2, %p340_p1 }
   0xa   :  { %p343_p4 = pnand %p342_p3, %p336_p0 }
   0xc   :  { %346 = shalt.err (!%p343_p4)
}
   0xd   :  { %36 = dma.hbm_to_vmem [thread:$0]  %s513_s1, 128, %s34_s25, [#allocation6]  }
   0xe   :  { %s355_s8 = scalar_lea.vmem %s24_s27, 128  ;;  %p360_p6 = scmp.lt.s32.totalorder %s24_s27, %s24_s27 }
   0xf   :  { %p356_p5 = scmp.ne.s32.totalorder %s24_s27, %s355_s8  ;;  %p361_p7 = scmp.lt.s32.totalorder %s355_s8, %s355_s8 }
  0x11   :  { %p362_p8 = por %p361_p7, %p360_p6 }
  0x13   :  { %p363_p9 = pnand %p362_p8, %p356_p5 }
  0x15   :  { %366 = shalt.err (!%p363_p9)
}
  0x16   :  { %26 = dma.hbm_to_vmem [thread:$0]  %s512_s0, 128, %s24_s27, [#allocation3]  }
  0x17   :  { %s437_s11 = smov [#allocation7]  }
  0x18   :  { %s42_s12 = sshll.u32 %s437_s11, 4  ;;  %s43_s12 = int_to_ptr.vmem [resolvable:$true] %s42_s12 }
  0x19   :  { %s375_s13 = scalar_lea.vmem %s43_s12, 256  ;;  %p380_p11 = scmp.lt.s32.totalorder %s43_s12, %s43_s12 }
  0x1a   :  { %p376_p10 = scmp.ne.s32.totalorder %s43_s12, %s375_s13  ;;  %p381_p12 = scmp.lt.s32.totalorder %s375_s13, %s375_s13 }
  0x1c   :  { %p382_p13 = por %p381_p12, %p380_p11 }
  0x1e   :  { %p383_p0 = pnand %p382_p13, %p376_p10 }
  0x20   :  { %386 = shalt.err (!%p383_p0)
}
  0x21   :  { %s438_s1 = smov 128   ;;  %s439_s14 = smov 8  }
  0x22   :  { %48 = dma.hbm_to_vmem [thread:$0]  %s514_s2, 256, %s43_s12, [#allocation6], %s438_s1, %s438_s1, %s439_s14  }
  0x23   :  { %s440_s17 = smov [#allocation8]  }
  0x24   :  { %s56_s18 = sshll.u32 %s440_s17, 4  ;;  %s57_s18 = int_to_ptr.vmem [resolvable:$true] %s56_s18 }
  0x25   :  { %s395_s0 = scalar_lea.vmem %s57_s18, 512  ;;  %p400_p2 = scmp.lt.s32.totalorder %s57_s18, %s57_s18 }
  0x26   :  { %p396_p1 = scmp.ne.s32.totalorder %s57_s18, %s395_s0  ;;  %p401_p3 = scmp.lt.s32.totalorder %s395_s0, %s395_s0 }
  0x28   :  { %p402_p4 = por %p401_p3, %p400_p2 }
  0x2a   :  { %p403_p5 = pnand %p402_p4, %p396_p1 }
  0x2c   :  { %406 = shalt.err (!%p403_p5)
}
  0x2d   :  { %62 = dma.hbm_to_vmem [thread:$0]  %s516_s4, 512, %s57_s18, [#allocation9], %s438_s1, %s438_s1, %s439_s14  }
  0x2e   :  { %427 = dma.done.wait [#allocation3], 128  }
  0x2f   :  { %428 = vsyncadd [#allocation3], 4294967168 }
  0x30   :  { %429 = dma.done.wait [#allocation6], 384  }
  0x31   :  { %430 = vsyncadd [#allocation6], 4294966912 }
  0x32   :  { %431 = dma.done.wait [#allocation9], 512  }
  0x33   :  { %432 = vsyncadd [#allocation9], 4294966784  ;;  %v441_v0 = vmov 0.0   ;;  %vm442_vm0 = vmmov 0   ;;  %v80_v1 = vld [vmem:[#allocation7 + $0x8] sm:$0xff]  ;;  %v79_v2 = vld [vmem:[#allocation7] sm:$0xff] }
  0x34   :  { %295 = vmatprep.subr.mxu0 %v441_v0  ;;  %299 = vmatprep.mubr.msk.f32.mxu0 %vm442_vm0, %v441_v0  ;;  %v77_v3 = vld [vmem:[#allocation2] sm:$0xff]  ;;  %vm88_vm1 = vcmask 130048   ;;  %v166_v4 = vld [vmem:[#allocation8 + $0x18] sm:$0xff]  ;;  %v165_v5 = vld [vmem:[#allocation8 + $0x10] sm:$0xff]  ;;  %vm174_vm2 = vcmask 261120   ;;  %s443_s23 = smov 112  }
  0x35   :  { %302 = vmatprep.subr.mxu1 %v441_v0  ;;  %310 = vmatprep.mubr.msk.f32.mxu1 %vm442_vm0, %v441_v0  ;;  %v164_v6 = vld [vmem:[#allocation8 + $0x8] sm:$0xff]  ;;  %v163_v7 = vld [vmem:[#allocation8] sm:$0xff]  ;;  %vm260_vm3 = vcmask 7168   ;;  %s444_s25 = smov [#allocation10]  }
  0x36   :  { %296 = vmatpush3.msra.mxu0 %v80_v1  ;;  %303 = vmatpush3.msra.mxu1 %v166_v4  ;;  %v283_v8 = vld [vmem:[%s515_s3] ss:$0 sm:$0xff]  ;;  %v78_v21 = vld [vmem:[#allocation5] sm:$0xff] }
  0x37   :  { %297 = vmatprep.subr.mxu0 %v441_v0  ;;  %304 = vmatprep.subr.mxu1 %v441_v0  ;;  %v285_v13 = vld [vmem:[%s517_s5] ss:$0 sm:$0xff]  ;;  %s268_s5 = sshll.u32 %s444_s25, 4  ;;  %s269_s5 = int_to_ptr.vmem [resolvable:$true] %s268_s5 }
  0x38   :  { %298 = vmatpush3.msra.mxu0 %v79_v2  ;;  %305 = vmatpush3.msra.mxu1 %v165_v5  ;;  %s407_s26 = scalar_lea.vmem %s269_s5, 128  ;;  %p412_p7 = scmp.lt.s32.totalorder %s269_s5, %s269_s5 }
  0x39   :  { %300 = vmatmul.mubr.msk.f32.vlgmr.msra.gmra.mxu0 %vm88_vm1, %v77_v3  ;;  %306 = vmatprep.subr.mxu1 %v441_v0  ;;  %p408_p6 = scmp.ne.s32.totalorder %s269_s5, %s407_s26  ;;  %p413_p8 = scmp.lt.s32.totalorder %s407_s26, %s407_s26 }
  0x3a   :  { %307 = vmatpush3.msra.mxu1 %v164_v6 }
  0x3b   :  { %308 = vmatprep.subr.mxu1 %v441_v0  ;;  %p414_p9 = por %p413_p8, %p412_p7 }
  0x3c   :  { %309 = vmatpush3.msra.mxu1 %v163_v7 }
  0x3d   :  { %p415_p10 = pnand %p414_p9, %p408_p6 }
  0xf9   :  { %v158_v9 = vpop.f32.mrf.mxu0 }
  0xfa   :  { %v159_v10 = vadd.f32 %v283_v8, %v158_v9 }
  0xfb   :  { %v301_v11 = vpop.f32.mrf.mxu0 }
  0xfc   :  { %323 = vtanh.f32 %v159_v10 }
 0x109   :  { %v324_v12 = vpop.eup %323 }
 0x10a   :  { %311 = vmatmul.mubr.msk.f32.vlgmr.msra.gmra.mxu1 %vm174_vm2, %v324_v12 }
 0x1ca   :  { %v244_v14 = vpop.f32.mrf.mxu1 }
 0x1cb   :  { %v245_v15 = vadd.f32 %v285_v13, %v244_v14 }
 0x1cc   :  { %v312_v16 = vpop.f32.mrf.mxu1 }
 0x1cd   :  { %v248_v17 = vsel %vm88_vm1, %v245_v15, 0.0  ;;  %v251_v18 = vmul.f32 1.442695, %v245_v15 }
 0x1ce   :  { %249 = vadd.xlane.f32.xlu0 %v248_v17 }
 0x1cf   :  { %325 = vpow2.f32 %v251_v18 }
 0x1dc   :  { %v326_v19 = vpop.eup %325 }
 0x1dd   :  { %v253_v22 = vmul.f32 %v326_v19, %v78_v21 }
 0x1e4   :  { %255 = vrot.lane.b32.xlu0 %v245_v15, %s443_s23 }
 0x257   :  { %v250_v20 = vpop.xlane.xlu0 %249 }
 0x258   :  { %261 = vst.msk [vmem:[%s519_s7] sm:$0xff] %vm260_vm3, %v250_v20 }
 0x25b   :  { %v256_v23 = vpop.permute.xlu0 %255 }
 0x25c   :  { %v258_v24 = vadd.f32 %v256_v23, %v253_v22 }
 0x25e   :  { %259 = vst.msk [vmem:[#allocation10] sm:$0xff] %vm88_vm1, %v258_v24 }
 0x25f   :  { %418 = shalt.err (!%p415_p10)
}
 0x260   :  { %271 = dma.vmem_to_hbm [thread:$0]  %s269_s5, 128, %s518_s6, [#allocation4]  }
 0x261   :  { %433 = dma.done.wait [#allocation4], 128  }
 0x262   :  { %434 = vsyncadd [#allocation4], 4294967168 }
 0x263   :  { %279 = vsyncpa [#allocation3], 1 }
 0x264   :  { %280 = vsyncpa [#allocation6], 1 }
 0x265   :  { %281 = vsyncpa [#allocation9], 1 }
 0x266   :  { %282 = vsyncpa [#allocation4], 1 }

</bundles_post_ra>
